<compile_context>
chip_gen: v5e
topology: v5e:2x2
jax: 0.10.0
libtpu: 0.0.40
codegen_flags: <defaults>
</compile_context>

<pallas_src>
import functools
import math

import numpy as np
import jax
import jax.numpy as jnp
from jax.experimental import pallas as pl
from jax.experimental.pallas import tpu as pltpu


# ----------------------------- host-side constant prep -----------------------------

def _round_up(v, m):
    return -(-v // m) * m


def build_constants(num_nodes, window, stride, padding):
    """Builds (additive mask bias, combined scatter, window-broadcast, window-sum, l_out)."""
    n, w = num_nodes, window

    # to_conv_mask: mask[node, win] = 1 iff position is inside the un-padded span
    mask = np.ones((n, w), dtype=np.float32)
    for i in range(n):
        for j in range(w):
            dist_front = i * stride + j
            dist_end = (n - i - 1) * stride + (w - j - 1)
            if dist_front < padding or dist_end < padding:
                mask[i, j] = 0.0
    assert mask.sum(axis=1).min() > 0, "every node needs >= 1 unmasked window slot"

    # flat logits index is w*N + n (PyTorch view(B, window, num_nodes), node fastest)
    mask_flat = mask.T.reshape(-1)                                   # (W*N,)
    mask_add = np.where(mask_flat > 0.5, 0.0, -1e30).astype(np.float32)[None, :]  # (1, W*N)

    # combined identity-ConvTranspose1d scatter, padded to a lane-dense 128-wide output
    l_out = w + (n - 1) * stride - 2 * padding
    l_pad = _round_up(max(l_out, 1), 128)
    scatter = np.zeros((w * n, l_pad), dtype=np.float32)
    for ww in range(w):
        for nn in range(n):
            l = nn * stride + ww - padding
            if 0 <= l < l_out:
                scatter[ww * n + nn, l] = 1.0

    # window broadcast (N, W*N) and window group-sum (W*N, N) 0/1 matrices
    gb = np.zeros((n, w * n), dtype=np.float32)
    for ww in range(w):
        for nn in range(n):
            gb[nn, ww * n + nn] = 1.0
    gs = gb.T.copy()

    return mask_add, scatter, gb, gs, l_out


# ----------------------------- Pallas kernel -----------------------------

def _multi_decision_kernel(x_ref, path_ref, wt_ref, b_ref, gb_ref, gs_ref, s_ref,
                           o_ref, *, window, num_nodes):
    n = num_nodes

    # fused logits: temperature and conv mask are already folded into wt / bias
    lg = jnp.dot(x_ref[...], wt_ref[...],
                 preferred_element_type=jnp.float32) + b_ref[...]      # (TB, W*N)

    # per-node max over the window slots (static lane slices of a value)
    m = lg[:, 0:n]
    for w in range(1, window):
        m = jnp.maximum(m, lg[:, w * n:(w + 1) * n])                   # (TB, N)

    # broadcast the max back over window slots on the MXU, exponentiate (EUP)
    m_flat = jnp.dot(m, gb_ref[...], preferred_element_type=jnp.float32)   # (TB, W*N)
    e = jnp.exp(lg - m_flat)                                               # masked -> 0

    # per-node denominator (group-sum on MXU), reciprocal on EUP, scale by path
    denom = jnp.dot(e, gs_ref[...], preferred_element_type=jnp.float32)    # (TB, N)
    scale = path_ref[...] * pl.reciprocal(denom, approx=True)              # (TB, N)
    y = e * jnp.dot(scale, gb_ref[...], preferred_element_type=jnp.float32)  # (TB, W*N)

    # identity transposed conv == one scatter matmul into a lane-dense output
    o_ref[...] = jnp.dot(y, s_ref[...], preferred_element_type=jnp.float32)


def multi_decision_forward(x, path, wt_scaled, bias_masked, gb, gs, scatter,
                           *, window, num_nodes, l_out, tile_b=256):
    b, f = x.shape
    n = num_nodes
    wn = window * n
    l_pad = scatter.shape[1]

    # batch tiling: sublane-aligned tile, pad batch with zero rows (path=0 -> out=0)
    tb = min(tile_b, _round_up(b, 8))
    b_pad = _round_up(b, tb)
    if b_pad != b:
        x = jnp.pad(x, ((0, b_pad - b), (0, 0)))
        path = jnp.pad(path, ((0, b_pad - b), (0, 0)))

    kernel = functools.partial(_multi_decision_kernel,
                               window=window, num_nodes=num_nodes)

    out = pl.pallas_call(
        kernel,
        out_shape=jax.ShapeDtypeStruct((b_pad, l_pad), jnp.float32),
        grid=(b_pad // tb,),
        in_specs=[
            pl.BlockSpec((tb, f), lambda i: (i, 0)),        # x
            pl.BlockSpec((tb, n), lambda i: (i, 0)),        # path
            pl.BlockSpec((f, wn), lambda i: (0, 0)),        # wt (scaled by 1/T)
            pl.BlockSpec((1, wn), lambda i: (0, 0)),        # bias (+ additive mask)
            pl.BlockSpec((n, wn), lambda i: (0, 0)),        # window broadcast matrix
            pl.BlockSpec((wn, n), lambda i: (0, 0)),        # window group-sum matrix
            pl.BlockSpec((wn, l_pad), lambda i: (0, 0)),    # combined scatter (padded)
        ],
        out_specs=pl.BlockSpec((tb, l_pad), lambda i: (i, 0)),
        compiler_params=pltpu.CompilerParams(
            dimension_semantics=("parallel",),
            vmem_limit_bytes=32 * 1024 * 1024,
        ),
    )(x, path, wt_scaled, bias_masked, gb, gs, scatter)

    return out[:b, :l_out]


# ----------------------------- pure numpy reference -----------------------------

def reference_forward(x, wt, bias, path, num_nodes, window, stride, padding,
                      temperature):
    l_out = window + (num_nodes - 1) * stride - 2 * padding
    b = x.shape[0]
    mask = np.ones((num_nodes, window), dtype=np.float32)
    for i in range(num_nodes):
        for j in range(window):
            if i * stride + j < padding or \
               (num_nodes - i - 1) * stride + (window - j - 1) < padding:
                mask[i, j] = 0.0
    mask_wn = mask.T  # (window, num_nodes)

    logits = (x @ wt + bias).reshape(b, window, num_nodes) / temperature
    logits = np.where(mask_wn[None] > 0.5, logits, -1e30)
    m = logits.max(axis=1, keepdims=True)
    e = np.exp(logits - m)
    p = e / e.sum(axis=1, keepdims=True)          # softmax over the window axis
    y = p * path[:, None, :]                      # (B, W, N)

    out = np.zeros((b, l_out), dtype=np.float64)
    for nn in range(num_nodes):
        for w in range(window):
            l = nn * stride + w - padding
            if 0 <= l < l_out:
                out[:, l] += y[:, w, nn]
    return out


# ----------------------------- main -----------------------------

if __name__ == "__main__":
    B = 2
    NUM_FEATURES = 32
    NUM_NODES = 8
    WINDOW = 4
    STRIDE = WINDOW          # module default: stride = window
    PADDING = 1              # exercises the conv mask
    TEMPERATURE = 1.0
    # hidden_units = 0  -> Transition is a single nn.Linear(F, window*num_nodes)

    key = jax.random.PRNGKey(0)
    kx, kp, kw, kb = jax.random.split(key, 4)

    x = jax.random.normal(kx, (B, NUM_FEATURES), dtype=jnp.float32)
    path = jax.random.uniform(kp, (B, NUM_NODES), dtype=jnp.float32)

    bound = 1.0 / math.sqrt(NUM_FEATURES)
    wt = jax.random.uniform(kw, (NUM_FEATURES, WINDOW * NUM_NODES),
                            minval=-bound, maxval=bound, dtype=jnp.float32)
    bias = jax.random.uniform(kb, (1, WINDOW * NUM_NODES),
                              minval=-bound, maxval=bound, dtype=jnp.float32)

    mask_add_np, scatter_np, gb_np, gs_np, L_OUT = build_constants(
        NUM_NODES, WINDOW, STRIDE, PADDING)

    # fold 1/temperature and the conv mask into the linear parameters (host side)
    inv_t = 1.0 / float(TEMPERATURE)
    wt_scaled = wt * inv_t
    bias_masked = bias * inv_t + jnp.asarray(mask_add_np)

    out = multi_decision_forward(
        x, path, wt_scaled, bias_masked,
        jnp.asarray(gb_np), jnp.asarray(gs_np), jnp.asarray(scatter_np),
        window=WINDOW, num_nodes=NUM_NODES, l_out=L_OUT)
    out = jax.block_until_ready(out)

    ref = reference_forward(np.asarray(x), np.asarray(wt), np.asarray(bias),
                            np.asarray(path), NUM_NODES, WINDOW, STRIDE, PADDING,
                            TEMPERATURE)

    assert out.shape == (B, L_OUT), (out.shape, (B, L_OUT))
    # tolerance loosened slightly for pl.reciprocal(approx=True) on the EUP
    np.testing.assert_allclose(np.asarray(out), ref, rtol=2e-3, atol=2e-3)
    print("KERNEL_OK")
</pallas_src>

<mosaic_0001>
module attributes {stable_mosaic.version = 11 : i64} {
  func.func @_multi_decision_kernel(%arg0: i32, %arg1: memref<8x32xf32, #tpu.memory_space<vmem>>, %arg2: memref<8x8xf32, #tpu.memory_space<vmem>>, %arg3: memref<32x32xf32, #tpu.memory_space<vmem>>, %arg4: memref<1x32xf32, #tpu.memory_space<vmem>>, %arg5: memref<8x32xf32, #tpu.memory_space<vmem>>, %arg6: memref<32x8xf32, #tpu.memory_space<vmem>>, %arg7: memref<32x128xf32, #tpu.memory_space<vmem>>, %arg8: memref<8x128xf32, #tpu.memory_space<vmem>>) attributes {dimension_semantics = [#tpu.dimension_semantics<parallel>], iteration_bounds = array<i64: 1>, scalar_prefetch = 0 : i64, scratch_operands = 0 : i64, tpu.core_type = #tpu.core_type<tc>, window_params = [{transform_indices = @transform_0, window_bounds = array<i64: 8, 32>}, {transform_indices = @transform_1, window_bounds = array<i64: 8, 8>}, {pipeline_mode = #tpu.pipeline_mode<synchronous>, transform_indices = @transform_2, window_bounds = array<i64: 32, 32>}, {pipeline_mode = #tpu.pipeline_mode<synchronous>, transform_indices = @transform_3, window_bounds = array<i64: 1, 32>}, {pipeline_mode = #tpu.pipeline_mode<synchronous>, transform_indices = @transform_4, window_bounds = array<i64: 8, 32>}, {pipeline_mode = #tpu.pipeline_mode<synchronous>, transform_indices = @transform_5, window_bounds = array<i64: 32, 8>}, {pipeline_mode = #tpu.pipeline_mode<synchronous>, transform_indices = @transform_6, window_bounds = array<i64: 32, 128>}, {transform_indices = @transform_7, window_bounds = array<i64: 8, 128>}]} {
    %c0 = arith.constant 0 : index
    %c0_0 = arith.constant 0 : index
    %0 = vector.load %arg1[%c0, %c0_0] : memref<8x32xf32, #tpu.memory_space<vmem>>, vector<8x32xf32>
    %c0_1 = arith.constant 0 : index
    %c0_2 = arith.constant 0 : index
    %1 = vector.load %arg3[%c0_1, %c0_2] : memref<32x32xf32, #tpu.memory_space<vmem>>, vector<32x32xf32>
    %cst = arith.constant dense<0.000000e+00> : vector<8x32xf32>
    %2 = tpu.matmul %0, %1, %cst {dimension_numbers = #tpu.dot_dimension_numbers<[1], [0], [0], [1], [0, 0, 1, 1], [], []>} : vector<8x32xf32>, vector<32x32xf32>, vector<8x32xf32> -> vector<8x32xf32>
    %c0_3 = arith.constant 0 : index
    %c0_4 = arith.constant 0 : index
    %3 = vector.load %arg4[%c0_3, %c0_4] : memref<1x32xf32, #tpu.memory_space<vmem>>, vector<1x32xf32>
    %4 = vector.broadcast %3 : vector<1x32xf32> to vector<8x32xf32>
    %5 = arith.addf %2, %4 : vector<8x32xf32>
    %6 = vector.extract_strided_slice %5 {offsets = [0, 0], sizes = [8, 8], strides = [1, 1]} : vector<8x32xf32> to vector<8x8xf32>
    %7 = vector.extract_strided_slice %5 {offsets = [0, 8], sizes = [8, 8], strides = [1, 1]} : vector<8x32xf32> to vector<8x8xf32>
    %8 = arith.maximumf %6, %7 : vector<8x8xf32>
    %9 = vector.extract_strided_slice %5 {offsets = [0, 16], sizes = [8, 8], strides = [1, 1]} : vector<8x32xf32> to vector<8x8xf32>
    %10 = arith.maximumf %8, %9 : vector<8x8xf32>
    %11 = vector.extract_strided_slice %5 {offsets = [0, 24], sizes = [8, 8], strides = [1, 1]} : vector<8x32xf32> to vector<8x8xf32>
    %12 = arith.maximumf %10, %11 : vector<8x8xf32>
    %c0_5 = arith.constant 0 : index
    %c0_6 = arith.constant 0 : index
    %13 = vector.load %arg5[%c0_5, %c0_6] : memref<8x32xf32, #tpu.memory_space<vmem>>, vector<8x32xf32>
    %cst_7 = arith.constant dense<0.000000e+00> : vector<8x32xf32>
    %14 = tpu.matmul %12, %13, %cst_7 {dimension_numbers = #tpu.dot_dimension_numbers<[1], [0], [0], [1], [0, 0, 1, 1], [], []>} : vector<8x8xf32>, vector<8x32xf32>, vector<8x32xf32> -> vector<8x32xf32>
    %15 = arith.subf %5, %14 : vector<8x32xf32>
    %16 = math.exp %15 : vector<8x32xf32>
    %c0_8 = arith.constant 0 : index
    %c0_9 = arith.constant 0 : index
    %17 = vector.load %arg6[%c0_8, %c0_9] : memref<32x8xf32, #tpu.memory_space<vmem>>, vector<32x8xf32>
    %cst_10 = arith.constant dense<0.000000e+00> : vector<8x8xf32>
    %18 = tpu.matmul %16, %17, %cst_10 {dimension_numbers = #tpu.dot_dimension_numbers<[1], [0], [0], [1], [0, 0, 1, 1], [], []>} : vector<8x32xf32>, vector<32x8xf32>, vector<8x8xf32> -> vector<8x8xf32>
    %c0_11 = arith.constant 0 : index
    %c0_12 = arith.constant 0 : index
    %19 = vector.load %arg2[%c0_11, %c0_12] : memref<8x8xf32, #tpu.memory_space<vmem>>, vector<8x8xf32>
    %20 = tpu.reciprocal %18 {approx = true} : vector<8x8xf32> -> vector<8x8xf32>
    %21 = arith.mulf %19, %20 : vector<8x8xf32>
    %c0_13 = arith.constant 0 : index
    %c0_14 = arith.constant 0 : index
    %22 = vector.load %arg5[%c0_13, %c0_14] : memref<8x32xf32, #tpu.memory_space<vmem>>, vector<8x32xf32>
    %cst_15 = arith.constant dense<0.000000e+00> : vector<8x32xf32>
    %23 = tpu.matmul %21, %22, %cst_15 {dimension_numbers = #tpu.dot_dimension_numbers<[1], [0], [0], [1], [0, 0, 1, 1], [], []>} : vector<8x8xf32>, vector<8x32xf32>, vector<8x32xf32> -> vector<8x32xf32>
    %24 = arith.mulf %16, %23 : vector<8x32xf32>
    %c0_16 = arith.constant 0 : index
    %c0_17 = arith.constant 0 : index
    %25 = vector.load %arg7[%c0_16, %c0_17] : memref<32x128xf32, #tpu.memory_space<vmem>>, vector<32x128xf32>
    %cst_18 = arith.constant dense<0.000000e+00> : vector<8x128xf32>
    %26 = tpu.matmul %24, %25, %cst_18 {dimension_numbers = #tpu.dot_dimension_numbers<[1], [0], [0], [1], [0, 0, 1, 1], [], []>} : vector<8x32xf32>, vector<32x128xf32>, vector<8x128xf32> -> vector<8x128xf32>
    %c0_19 = arith.constant 0 : index
    %c0_20 = arith.constant 0 : index
    %27 = vector.load %arg8[%c0_19, %c0_20] : memref<8x128xf32, #tpu.memory_space<vmem>>, vector<8x128xf32>
    tpu.vector_store %arg8[%c0_19, %c0_20], %26 {strides = array<i32>} : memref<8x128xf32, #tpu.memory_space<vmem>>, vector<8x128xf32>,
    return
  }
  func.func @transform_0(%arg0: i32) -> (i32, i32) {
    %c0_i32 = arith.constant 0 : i32
    %c0_i32_0 = arith.constant 0 : i32
    return %arg0, %c0_i32 : i32, i32
  }
  func.func @transform_1(%arg0: i32) -> (i32, i32) {
    %c0_i32 = arith.constant 0 : i32
    %c0_i32_0 = arith.constant 0 : i32
    return %arg0, %c0_i32 : i32, i32
  }
  func.func @transform_2(%arg0: i32) -> (i32, i32) {
    %c0_i32 = arith.constant 0 : i32
    %c0_i32_0 = arith.constant 0 : i32
    %c0_i32_1 = arith.constant 0 : i32
    return %c0_i32, %c0_i32_0 : i32, i32
  }
  func.func @transform_3(%arg0: i32) -> (i32, i32) {
    %c0_i32 = arith.constant 0 : i32
    %c0_i32_0 = arith.constant 0 : i32
    %c0_i32_1 = arith.constant 0 : i32
    return %c0_i32, %c0_i32_0 : i32, i32
  }
  func.func @transform_4(%arg0: i32) -> (i32, i32) {
    %c0_i32 = arith.constant 0 : i32
    %c0_i32_0 = arith.constant 0 : i32
    %c0_i32_1 = arith.constant 0 : i32
    return %c0_i32, %c0_i32_0 : i32, i32
  }
  func.func @transform_5(%arg0: i32) -> (i32, i32) {
    %c0_i32 = arith.constant 0 : i32
    %c0_i32_0 = arith.constant 0 : i32
    %c0_i32_1 = arith.constant 0 : i32
    return %c0_i32, %c0_i32_0 : i32, i32
  }
  func.func @transform_6(%arg0: i32) -> (i32, i32) {
    %c0_i32 = arith.constant 0 : i32
    %c0_i32_0 = arith.constant 0 : i32
    %c0_i32_1 = arith.constant 0 : i32
    return %c0_i32, %c0_i32_0 : i32, i32
  }
  func.func @transform_7(%arg0: i32) -> (i32, i32) {
    %c0_i32 = arith.constant 0 : i32
    %c0_i32_0 = arith.constant 0 : i32
    return %arg0, %c0_i32 : i32, i32
  }
}

</mosaic_0001>

<bundles_post_ra>
// kernel: tpu_custom_call.1
= control target key start
LH: loop header
LB: loop body
LE: loop exit
PB: predicated region body
PF: predicated region fallthrough
CT: control target
= control target key end

     0   :  { %12 = vsyncpa [#allocation3], 0  ;;  %s461_s0 = inlined_call_operand.vmem [shape: f32[8,32], index: 0, kind: input, shape index: {}]   ;;  %s462_s1 = inlined_call_operand.hbm [shape: f32[8,8], index: 1, kind: input, shape index: {}]   ;;  %s463_s2 = inlined_call_operand.vmem [shape: f32[32,32], index: 2, kind: input, shape index: {}]   ;;  %s464_s3 = inlined_call_operand.vmem [shape: f32[1,32], index: 3, kind: input, shape index: {}]   ;;  %s465_s4 = inlined_call_operand.hbm [shape: f32[8,32], index: 4, kind: input, shape index: {}]   ;;  %s466_s5 = inlined_call_operand.vmem [shape: f32[32,8], index: 5, kind: input, shape index: {}]   ;;  %s467_s6 = inlined_call_operand.hbm [shape: f32[32,128], index: 6, kind: input, shape index: {}]   ;;  %s468_s7 = inlined_call_operand.hbm [shape: f32[8,128], index: 7, kind: output, shape index: {}]  }
   0x1   :  { %13 = vsyncpa [#allocation6], 0  ;;  %s37_s26 = sshll.u32 %s465_s4, 4  ;;  %s38_s26 = int_to_ptr.hbm [resolvable:$true] %s37_s26 }
   0x2   :  { %14 = vsyncpa [#allocation4], 0  ;;  %s365_s27 = smov [#allocation5]   ;;  %s22_s8 = sshll.u32 %s462_s1, 4  ;;  %s23_s8 = int_to_ptr.hbm [resolvable:$true] %s22_s8 }
   0x3   :  { %s39_s28 = sshll.u32 %s365_s27, 4  ;;  %s366_s9 = smov [#allocation2]   ;;  %s40_s28 = int_to_ptr.vmem [resolvable:$true] %s39_s28 }
   0x4   :  { %42 = dma.hbm_to_vmem [thread:$0]  %s38_s26, 128, %s40_s28, [#allocation6]  }
   0x5   :  { %s24_s10 = sshll.u32 %s366_s9, 4  ;;  %s49_s13 = sshll.u32 %s467_s6, 4  ;;  %s25_s10 = int_to_ptr.vmem [resolvable:$true] %s24_s10  ;;  %s50_s13 = int_to_ptr.hbm [resolvable:$true] %s49_s13 }
   0x6   :  { %27 = dma.hbm_to_vmem [thread:$0]  %s23_s8, 128, %s25_s10, [#allocation3]  }
   0x7   :  { %s367_s4 = smov [#allocation7]   ;;  %s368_s15 = smov 128  }
   0x8   :  { %s51_s14 = sshll.u32 %s367_s4, 4  ;;  %s369_s16 = smov 8   ;;  %s52_s14 = int_to_ptr.vmem [resolvable:$true] %s51_s14 }
   0x9   :  { %57 = dma.hbm_to_vmem [thread:$0]  %s50_s13, 512, %s52_s14, [#allocation6], %s368_s15, %s368_s15, %s369_s16  }
   0xa   :  { %359 = dma.done.wait [#allocation3], 128  }
   0xb   :  { %360 = vsyncadd [#allocation3], 4294967168 }
   0xc   :  { %361 = dma.done.wait [#allocation6], 640  }
   0xd   :  { %362 = vsyncadd [#allocation6], 4294966656  ;;  %v74_v0 = vld [vmem:[%s463_s2 + $0x18] sm:$0xff]  ;;  %v73_v1 = vld [vmem:[%s463_s2 + $0x10] sm:$0xff]  ;;  %vm79_vm0 = vcmask 261120   ;;  %s370_s27 = smov 104  }
   0xe   :  { %95 = vmatpush.msra.mxu0 %v74_v0  ;;  %v72_v2 = vld [vmem:[%s463_s2 + $0x8] sm:$0xff]  ;;  %v71_v3 = vld [vmem:[%s463_s2] sm:$0xff]  ;;  %s371_s28 = smov 120   ;;  %s372_s2 = smov 112   ;;  %vm117_vm1 = vcmask 64512   ;;  %v147_v15 = vld [vmem:[%s466_s5 + $0x18] sm:$0xff] }
   0xf   :  { %v70_v4 = vld [vmem:[%s461_s0] sm:$0xff]  ;;  %v116_v8 = vld [vmem:[#allocation5] sm:$0xff]  ;;  %163 = vmatpush.msra.mxu2 %v147_v15  ;;  %v146_v16 = vld [vmem:[%s466_s5 + $0x10] sm:$0xff]  ;;  %s233_s14 = sshll.u32 %s468_s7, 4  ;;  %s234_s14 = int_to_ptr.hbm [resolvable:$true] %s233_s14 }
  0x10   :  { %96 = vmatpush.msra.mxu0 %v73_v1  ;;  %v258_v5 = vld [vmem:[%s464_s3] ss:$0 sm:$0xff]  ;;  %136 = vmatpush.msra.mxu1 %v116_v8  ;;  %v145_v17 = vld [vmem:[%s466_s5 + $0x8] sm:$0xff]  ;;  %v199_v25 = vld [vmem:[#allocation7 + $0x8] sm:$0xff] }
  0x11   :  { %192 = vmatpush.msra.mxu3 %v116_v8  ;;  %164 = vmatpush.msra.mxu2 %v146_v16  ;;  %v144_v18 = vld [vmem:[%s466_s5] sm:$0xff]  ;;  %v201_v23 = vld [vmem:[#allocation7 + $0x18] sm:$0xff]  ;;  %v198_v30 = vld [vmem:[#allocation7] sm:$0xff]  ;;  %s373_s5 = smov [#allocation8]  }
  0x12   :  { %97 = vmatpush.msra.mxu0 %v72_v2  ;;  %v200_v24 = vld [vmem:[#allocation7 + $0x10] sm:$0xff]  ;;  %217 = vmatpush.msrb.mxu1 %v201_v23  ;;  %s231_s12 = sshll.u32 %s373_s5, 4  ;;  %s232_s12 = int_to_ptr.vmem [resolvable:$true] %s231_s12 }
  0x13   :  { %165 = vmatpush.msra.mxu2 %v145_v17  ;;  %v171_v27 = vld [vmem:[#allocation2] sm:$0xff] }
  0x14   :  { %98 = vmatpush.msra.mxu0 %v71_v3  ;;  %218 = vmatpush.msrb.mxu1 %v200_v24 }
  0x15   :  { %244 = vmatmul.msk.f32.vlgmr.msra.gmra.mxu0 %vm79_vm0, %v70_v4  ;;  %166 = vmatpush.msra.mxu2 %v144_v18 }
  0x16   :  { %219 = vmatpush.msrb.mxu1 %v199_v25 }
  0x18   :  { %220 = vmatpush.msrb.mxu1 %v198_v30 }
  0x92   :  { %v100_v6 = vpop.f32.mrf.mxu0 }
  0x93   :  { %v101_v7 = vadd.f32 %v258_v5, %v100_v6 }
  0x95   :  { %112 = vrot.lane.b32.xlu1 %v101_v7, %s370_s27  ;;  %104 = vrot.lane.b32.xlu0 %v101_v7, %s371_s28 }
  0x9d   :  { %108 = vrot.lane.b32.xlu0 %v101_v7, %s372_s2 }
 0x107   :  { %v105_v9 = vpop.permute.xlu0 %104  ;;  %v113_v13 = vpop.permute.xlu1 %112 }
 0x108   :  { %v107_v10 = vmax.f32 %v101_v7, %v105_v9 }
 0x10f   :  { %v109_v11 = vpop.permute.xlu0 %108 }
 0x110   :  { %v111_v12 = vmax.f32 %v107_v10, %v109_v11 }
 0x112   :  { %v115_v14 = vmax.f32 %v111_v12, %v113_v13 }
 0x114   :  { %245 = vmatmul.msk.f32.vlgmr.msra.gmra.mxu1 %vm117_vm1, %v115_v14 }
 0x191   :  { %v138_v19 = vpop.f32.mrf.mxu1 }
 0x192   :  { %v141_v20 = vsub.f32 %v101_v7, %v138_v19 }
 0x194   :  { %v142_v21 = vmul.f32 1.442695, %v141_v20 }
 0x196   :  { %259 = vpow2.f32 %v142_v21 }
 0x19c   :  { %v260_v22 = vpop.eup %259 }
 0x19d   :  { %246 = vmatmul.msk.f32.vlgmr.msra.gmra.mxu2 %vm79_vm0, %v260_v22 }
 0x220   :  { %v168_v26 = vpop.f32.mrf.mxu2 }
 0x221   :  { %261 = vrcp.f32 %v168_v26 }
 0x227   :  { %v262_v28 = vpop.eup %261 }
 0x228   :  { %v173_v29 = vmul.f32 %v262_v28, %v171_v27 }
 0x22a   :  { %247 = vmatmul.msk.f32.vlgmr.msra.gmra.mxu3 %vm117_vm1, %v173_v29 }
 0x2ad   :  { %v194_v31 = vpop.f32.mrf.mxu3 }
 0x2ae   :  { %v197_v32 = vmul.f32 %v260_v22, %v194_v31 }
 0x2b0   :  { %248 = vmatmul.msk.f32.vlgmr.msrb.gmra.mxu1 %vm79_vm0, %v197_v32 }
 0x32d   :  { %v222_v33 = vpop.f32.mrf.mxu1 }
 0x32e   :  { %225 = vst [vmem:[#allocation8] sm:$0xff] %v222_v33 }
 0x32f   :  { %236 = dma.vmem_to_hbm [thread:$0]  %s232_s12, 128, %s234_s14, [#allocation4]  }
 0x330   :  { %363 = dma.done.wait [#allocation4], 128  }
 0x331   :  { %364 = vsyncadd [#allocation4], 4294967168 }
 0x332   :  { %241 = vsyncpa [#allocation3], 1 }
 0x333   :  { %242 = vsyncpa [#allocation6], 1 }
 0x334   :  { %243 = vsyncpa [#allocation4], 1 }

</bundles_post_ra>
